<compile_context>
chip_gen: v7x
topology: tpu7x:2x2x1
jax: 0.10.0
libtpu: 0.0.40
codegen_flags: <defaults>
</compile_context>

<pallas_src>
import math
from functools import partial

import jax
import jax.numpy as jnp
from jax import lax
from jax.experimental import pallas as pl
from jax.experimental.pallas import tpu as pltpu


_ONEHOT_MAX_VOCAB = 2048      # above this the one-hot FLOPs stop being "free"
_VOCAB_CHUNK = 256            # one-hot built in (tile, _VOCAB_CHUNK) slabs
_MAX_PREFETCH_IDS = 1 << 15   # cap on ids scalar-prefetched per pallas_call


def _round_up(x, m):
    return ((x + m - 1) // m) * m


def _vmem_capacity_bytes():
    try:
        return int(pltpu.get_tpu_info().vmem_capacity_bytes)
    except Exception:
        return 64 << 20       # conservative default: v7x per-core physical VMEM


# ----------------------------------------------------------------------------
# Path A: table resident in VMEM, gather = one-hot MXU matmul.
# ----------------------------------------------------------------------------
def _resident_onehot_kernel(ids_ref, tbl_ref, out_ref, *, scale, v_chunk):
    """ids_ref: (tile, 1) int32; tbl_ref: (V, d_pad) resident; out: (tile, d_pad)."""
    ids = ids_ref[...]                                   # (tile, 1)
    tile = out_ref.shape[0]
    v = tbl_ref.shape[0]
    n_chunks = (v + v_chunk - 1) // v_chunk              # static python int
    for c in range(n_chunks):                            # unrolled at trace time
        lo = c * v_chunk
        size = min(v_chunk, v - lo)
        col = lax.broadcasted_iota(jnp.int32, (tile, size), 1) + lo
        # sqrt(d_model) folded into the one-hot -> no extra VPU pass afterwards.
        onehot = jnp.where(col == ids, scale, 0.0).astype(tbl_ref.dtype)
        part = jnp.dot(onehot, tbl_ref[lo:lo + size, :],
                       preferred_element_type=jnp.float32)
        if c == 0:
            out_ref[...] = part.astype(out_ref.dtype)
        else:
            out_ref[...] += part.astype(out_ref.dtype)


def _embed_resident(ids, emb_table, *, d_pad, scale, tile_tokens, vmem_cap):
    n = ids.shape[0]
    v, d = emb_table.shape
    dtype = emb_table.dtype
    itemsize = jnp.dtype(dtype).itemsize

    # Lane-dense output for every D: pad columns up to a multiple of 128 and
    # slice back in the wrapper (unmasked vst in-kernel and dense HBM writeback).
    tbl = emb_table if d_pad == d else jnp.pad(emb_table, ((0, 0), (0, d_pad - d)))

    # Biggest tile that keeps the double-buffered out + id blocks inside VMEM.
    out_budget = max(vmem_cap // 4, 1 << 20)
    max_tile = max(8, (out_budget // (2 * d_pad * itemsize)) // 8 * 8)
    tile = max(8, min(tile_tokens, max_tile))
    tile = min(tile, _round_up(n, 8))
    tile = _round_up(tile, 8)
    n_pad = _round_up(n, tile)
    steps = n_pad // tile

    if n_pad != n:
        ids = jnp.pad(ids, (0, n_pad - n))     # pad with id 0 (valid, sliced off)
    ids2d = ids.reshape(n_pad, 1)

    vmem_needed = ((v * d_pad + 2 * tile * d_pad) * itemsize
                   + 2 * tile * 128 * 4 + (2 << 20))
    vmem_limit = int(min(vmem_cap * 0.75, max(vmem_needed, 32 << 20)))

    out = pl.pallas_call(
        partial(_resident_onehot_kernel, scale=scale,
                v_chunk=min(v, _VOCAB_CHUNK)),
        out_shape=jax.ShapeDtypeStruct((n_pad, d_pad), dtype),
        grid=(steps,),
        in_specs=[
            pl.BlockSpec((tile, 1), lambda i: (i, 0)),     # ids, per tile
            pl.BlockSpec((v, d_pad), lambda i: (0, 0)),    # table, VMEM resident
        ],
        out_specs=pl.BlockSpec((tile, d_pad), lambda i: (i, 0)),
        compiler_params=pltpu.CompilerParams(
            dimension_semantics=("parallel",),             # steps are independent
            vmem_limit_bytes=vmem_limit,
        ),
    )(ids2d, tbl)
    return out[:n, :d]


# ----------------------------------------------------------------------------
# Path B: table stays in HBM, per-row DMA gather, chunked + double-buffered.
# Only used when the table does not fit the (chip-aware) VMEM budget.
# ----------------------------------------------------------------------------
def _hbm_gather_kernel(ids_ref, emb_hbm, out_ref, vbuf, sem, *,
                       tile, chunk, n_chunks, scale):
    # ids_ref : (n_ids,)      int32, SMEM (scalar prefetch, capped per call)
    # emb_hbm : (V, D)        table left in HBM (memory_space=pl.ANY)
    # out_ref : (tile, D)     output block, VMEM
    # vbuf    : (2, chunk, D) gather scratch (double buffer)
    # sem     : (2,)          DMA semaphores, one per buffer slot
    base = pl.program_id(0) * tile

    def issue(c, slot):
        off = base + c * chunk

        @pl.loop(0, chunk)
        def _issue_row(r):
            tok = ids_ref[off + r]                          # already clamped
            pltpu.make_async_copy(
                emb_hbm.at[pl.ds(tok, 1), :],
                vbuf.at[slot, pl.ds(r, 1), :],
                sem.at[slot],
            ).start()

    def wait_chunk(slot):
        # One wait per issued row copy with the exact same (1, D) shape, so the
        # semaphore accounting is exact for any row size.  Chunk c+1's copies
        # are already in flight by now, so these are non-blocking decrements.
        # TODO(synk): collapse into one chunk-sized aggregated wait once the
        # byte-exact DMA-semaphore accounting is confirmed for sub-512B rows.
        @pl.loop(0, chunk)
        def _wait_row(r):
            pltpu.make_async_copy(
                emb_hbm.at[pl.ds(0, 1), :],
                vbuf.at[slot, pl.ds(0, 1), :],
                sem.at[slot],
            ).wait()

    issue(0, 0)

    def body(c, carry):
        slot = c % 2

        @pl.when(c + 1 < n_chunks)
        def _():
            issue(c + 1, 1 - slot)      # prefetch next chunk before waiting

        wait_chunk(slot)
        row0 = pl.multiple_of(c * chunk, chunk)
        out_ref[pl.ds(row0, chunk), :] = vbuf[slot] * scale
        return carry

    lax.fori_loop(0, n_chunks, body, 0)


def _hbm_gather_call(ids, emb_table, *, scale, tile_tokens, vmem_cap):
    n = ids.shape[0]
    _, d = emb_table.shape
    dtype = emb_table.dtype
    itemsize = jnp.dtype(dtype).itemsize

    chunk = min(128, _round_up(n, 8))
    out_budget = max(vmem_cap // 8, 1 << 20)
    max_tile = max(chunk, (out_budget // (2 * d * itemsize)) // chunk * chunk)
    tile = max(chunk, min(_round_up(tile_tokens, chunk), max_tile))
    tile = min(tile, _round_up(n, chunk))
    n_pad = _round_up(n, tile)
    steps = n_pad // tile
    n_chunks = tile // chunk

    if n_pad != n:
        ids = jnp.pad(ids, (0, n_pad - n))

    lane_d = max(d, 128)        # VMEM lane padding of the gather scratch
    vmem_needed = (2 * tile * d + 2 * chunk * lane_d) * itemsize + (2 << 20)
    vmem_limit = int(min(vmem_cap * 0.75, max(vmem_needed, 32 << 20)))

    # Note: if d < 128 the out stores are masked; this fallback is only hit for
    # tables too big for VMEM, where d >= 128 in any realistic configuration.
    out = pl.pallas_call(
        partial(_hbm_gather_kernel, tile=tile, chunk=chunk,
                n_chunks=n_chunks, scale=scale),
        out_shape=jax.ShapeDtypeStruct((n_pad, d), dtype),
        grid_spec=pltpu.PrefetchScalarGridSpec(
            num_scalar_prefetch=1,                         # ids -> SMEM
            grid=(steps,),
            in_specs=[pl.BlockSpec(memory_space=pl.ANY)],  # table stays in HBM
            out_specs=pl.BlockSpec((tile, d), lambda i, ids_ref: (i, 0)),
            scratch_shapes=[
                pltpu.VMEM((2, chunk, d), dtype),
                pltpu.SemaphoreType.DMA((2,)),
            ],
        ),
        compiler_params=pltpu.CompilerParams(
            dimension_semantics=("parallel",),
            vmem_limit_bytes=vmem_limit,
        ),
    )(ids, emb_table)
    return out[:n]


def _embed_hbm_gather(ids, emb_table, *, scale, tile_tokens, vmem_cap):
    # Chunk the call so the scalar-prefetched id vector stays small in SMEM.
    n = ids.shape[0]
    pieces = []
    for start in range(0, n, _MAX_PREFETCH_IDS):
        piece = ids[start:start + _MAX_PREFETCH_IDS]
        pieces.append(_hbm_gather_call(piece, emb_table, scale=scale,
                                       tile_tokens=tile_tokens,
                                       vmem_cap=vmem_cap))
    return pieces[0] if len(pieces) == 1 else jnp.concatenate(pieces, axis=0)


# ----------------------------------------------------------------------------
# Public wrapper.
# ----------------------------------------------------------------------------
def token_embedding(tokens, emb_table, *, tile_tokens=2048,
                    force_hbm_gather=False):
    """tokens: (B, S) int; emb_table: (V, D) -> (B, S, D) = emb[tokens]*sqrt(D).

    Out-of-range token ids are clamped to [0, V) (nn.Embedding would raise).
    """
    b, s = tokens.shape
    v, d = emb_table.shape
    n = b * s
    scale = math.sqrt(float(d))
    itemsize = jnp.dtype(emb_table.dtype).itemsize

    # Clamp once here (hoisted out of any per-token in-kernel loop).
    ids = jnp.clip(tokens.reshape(-1).astype(jnp.int32), 0, v - 1)

    vmem_cap = _vmem_capacity_bytes()     # 64 MiB (v7x) vs 128 MiB (v5e/v6e)
    d_pad = _round_up(d, 128)             # lane-dense output for every D
    table_res_bytes = v * d_pad * itemsize

    use_resident = (not force_hbm_gather
                    and table_res_bytes <= vmem_cap // 4
                    and v <= _ONEHOT_MAX_VOCAB)
    # TODO(synk): for mid-size vocabularies that still fit VMEM, a resident
    # dynamic-slice gather would beat both paths, especially on v5e's MXU.

    if use_resident:
        out = _embed_resident(ids, emb_table, d_pad=d_pad, scale=scale,
                              tile_tokens=tile_tokens, vmem_cap=vmem_cap)
    else:
        out = _embed_hbm_gather(ids, emb_table, scale=scale,
                                tile_tokens=tile_tokens, vmem_cap=vmem_cap)
    return out.reshape(b, s, d)


def init_token_embedding_params(key, vocab_size, d_model, padding_idx=None):
    """Matches nn.init.normal_(weight, std=d_model**-0.5) + zeroed padding row."""
    w = jax.random.normal(key, (vocab_size, d_model), dtype=jnp.float32)
    w = w * (d_model ** -0.5)
    if padding_idx is not None:
        w = w.at[padding_idx].set(0.0)
    return w


if __name__ == "__main__":
    key = jax.random.PRNGKey(0)
    k1, k2, k3, k4, k5, k6 = jax.random.split(key, 6)

    # --- Case 1: canonical small shape (resident one-hot path) ---------------
    vocab, d_model, pad_idx = 16, 32, 0
    b, s = 2, 8
    w = init_token_embedding_params(k1, vocab, d_model, pad_idx)
    tok = jax.random.randint(k2, (b, s), 0, vocab, dtype=jnp.int32)
    out = jax.block_until_ready(token_embedding(tok, w))
    ref = jnp.take(w, tok, axis=0) * math.sqrt(d_model)
    assert out.shape == (b, s, d_model)
    assert jnp.allclose(out, ref, atol=1e-5, rtol=1e-5)

    # --- Case 2: ragged B*S, multi-step grid, multi-vocab-chunk one-hot ------
    vocab2, d2 = 320, 32
    b2, s2 = 3, 50
    w2 = init_token_embedding_params(k3, vocab2, d2, 0)
    tok2 = jax.random.randint(k4, (b2, s2), 0, vocab2, dtype=jnp.int32)
    out2 = jax.block_until_ready(token_embedding(tok2, w2, tile_tokens=64))
    ref2 = jnp.take(w2, tok2, axis=0) * math.sqrt(d2)
    assert out2.shape == (b2, s2, d2)
    assert jnp.allclose(out2, ref2, atol=1e-5, rtol=1e-5)

    # --- Case 3: HBM DMA-gather fallback (forced; 2 chunks x 2 grid steps) ---
    vocab3, d3 = 64, 128
    b3, s3 = 4, 96
    w3 = init_token_embedding_params(k5, vocab3, d3, None)
    tok3 = jax.random.randint(k6, (b3, s3), 0, vocab3, dtype=jnp.int32)
    out3 = jax.block_until_ready(
        token_embedding(tok3, w3, tile_tokens=256, force_hbm_gather=True))
    ref3 = jnp.take(w3, tok3, axis=0) * math.sqrt(d3)
    assert out3.shape == (b3, s3, d3)
    assert jnp.allclose(out3, ref3, atol=1e-5, rtol=1e-5)

    print("KERNEL_OK")
</pallas_src>

<mosaic_0001>
module attributes {stable_mosaic.version = 11 : i64} {
  func.func @_resident_onehot_kernel(%arg0: i32, %arg1: memref<16x1xi32, #tpu.memory_space<vmem>>, %arg2: memref<16x128xf32, #tpu.memory_space<vmem>>, %arg3: memref<16x128xf32, #tpu.memory_space<vmem>>) attributes {dimension_semantics = [#tpu.dimension_semantics<parallel>], iteration_bounds = array<i64: 1>, scalar_prefetch = 0 : i64, scratch_operands = 0 : i64, tpu.core_type = #tpu.core_type<tc>, window_params = [{transform_indices = @transform_0, window_bounds = array<i64: 16, 1>}, {pipeline_mode = #tpu.pipeline_mode<synchronous>, transform_indices = @transform_1, window_bounds = array<i64: 16, 128>}, {transform_indices = @transform_2, window_bounds = array<i64: 16, 128>}]} {
    %c0 = arith.constant 0 : index
    %c0_0 = arith.constant 0 : index
    %0 = vector.load %arg1[%c0, %c0_0] : memref<16x1xi32, #tpu.memory_space<vmem>>, vector<16x1xi32>
    %1 = tpu.iota {dimensions = array<i32: 1>} : vector<16x16xi32>
    %c0_i32 = arith.constant 0 : i32
    %2 = vector.broadcast %c0_i32 : i32 to vector<16x16xi32>
    %3 = arith.addi %1, %2 : vector<16x16xi32>
    %4 = vector.broadcast %0 : vector<16x1xi32> to vector<16x16xi32>
    %5 = arith.cmpi eq, %3, %4 : vector<16x16xi32>
    %cst = arith.constant 5.65685415 : f32
    %cst_1 = arith.constant 0.000000e+00 : f32
    %6 = vector.broadcast %cst : f32 to vector<16x16xf32>
    %7 = vector.broadcast %cst_1 : f32 to vector<16x16xf32>
    %8 = arith.select %5, %6, %7 : vector<16x16xi1>, vector<16x16xf32>
    %c0_2 = arith.constant 0 : index
    %c0_3 = arith.constant 0 : index
    %9 = vector.load %arg2[%c0_2, %c0_3] : memref<16x128xf32, #tpu.memory_space<vmem>>, vector<16x128xf32>
    %cst_4 = arith.constant dense<0.000000e+00> : vector<16x128xf32>
    %10 = tpu.matmul %8, %9, %cst_4 {dimension_numbers = #tpu.dot_dimension_numbers<[1], [0], [0], [1], [0, 0, 1, 1], [], []>} : vector<16x16xf32>, vector<16x128xf32>, vector<16x128xf32> -> vector<16x128xf32>
    %c0_5 = arith.constant 0 : index
    %c0_6 = arith.constant 0 : index
    %11 = vector.load %arg3[%c0_5, %c0_6] : memref<16x128xf32, #tpu.memory_space<vmem>>, vector<16x128xf32>
    tpu.vector_store %arg3[%c0_5, %c0_6], %10 {strides = array<i32>} : memref<16x128xf32, #tpu.memory_space<vmem>>, vector<16x128xf32>,
    return
  }
  func.func @transform_0(%arg0: i32) -> (i32, i32) {
    %c0_i32 = arith.constant 0 : i32
    %c0_i32_0 = arith.constant 0 : i32
    return %arg0, %c0_i32 : i32, i32
  }
  func.func @transform_1(%arg0: i32) -> (i32, i32) {
    %c0_i32 = arith.constant 0 : i32
    %c0_i32_0 = arith.constant 0 : i32
    %c0_i32_1 = arith.constant 0 : i32
    return %c0_i32, %c0_i32_0 : i32, i32
  }
  func.func @transform_2(%arg0: i32) -> (i32, i32) {
    %c0_i32 = arith.constant 0 : i32
    %c0_i32_0 = arith.constant 0 : i32
    return %arg0, %c0_i32 : i32, i32
  }
}

</mosaic_0001>

<bundles_post_ra>
// kernel: tpu_custom_call.1
= control target key start
LH: loop header
LB: loop body
LE: loop exit
PB: predicated region body
PF: predicated region fallthrough
CT: control target
= control target key end

     0   :  { %s219_s0 = inlined_call_operand.vmem [shape: s32[16,1], index: 0, kind: input, shape index: {}]   ;;  %s220_s1 = inlined_call_operand.vmem [shape: f32[16,128], index: 1, kind: input, shape index: {}]   ;;  %s221_s2 = inlined_call_operand.hbm [shape: f32[16,128], index: 2, kind: output, shape index: {}]  }
   0x1   :  { %v12_v0 = vld [vmem:[%s219_s0] sm:$0xff] }
   0x2   :  { %7 = vsyncpa [#allocation3], 0  ;;  %v175_v1 = vmov 0   ;;  %v26_v2 = vld [vmem:[%s220_s1] sm:$0xff]  ;;  %v27_v3 = vld [vmem:[%s220_s1 + $0x8] sm:$0xff]  ;;  %v14_v6 = vlaneseq  ;;  %vm28_vm0 = vcmask 130048  }
   0x3   :  { %150 = vset.pattern.permute.xlu0 %v175_v1  ;;  %v141_v4 = vpack.c.bf16 %v27_v3, %v26_v2  ;;  %v13_v5 = vld [vmem:[%s219_s0 + $0x8] sm:$0xff]  ;;  %v176_v9 = vmov 0.0   ;;  %s177_s1 = smov [#allocation2]  }
   0x4   :  { %17 = vperm.xlu0 %150, %v12_v0   ;;  %v15_v7 = vand.u32 127, %v14_v6  ;;  %s117_s17 = sshll.u32 %s177_s1, 4  ;;  %s118_s17 = int_to_ptr.vmem [resolvable:$true] %s117_s17 }
   0x5   :  { %142 = vmatprep.subr.bf16.mxu0 %v141_v4  ;;  %s151_s0 = scalar_lea.vmem %s118_s17, 256  ;;  %p156_p1 = scmp.lt.s32.totalorder %s118_s17, %s118_s17 }
   0x6   :  { %144 = vmatpush3.bf16.msra.mxu0 %v141_v4  ;;  %p152_p0 = scmp.ne.s32.totalorder %s118_s17, %s151_s0  ;;  %p157_p2 = scmp.lt.s32.totalorder %s151_s0, %s151_s0 }
   0x8   :  { %20 = vperm.xlu0 %150, %v13_v5   ;;  %p158_p3 = por %p157_p2, %p156_p1 }
   0xa   :  { %p159_p4 = pnand %p158_p3, %p152_p0 }
  0x83   :  { %v18_v8 = vpop.permute.xlu0 %17 }
  0x84   :  { %vm22_vm1 = vcmp.eq.s32.totalorder %v15_v7, %v18_v8 }
  0x85   :  { %v24_v10 = vsel %vm22_vm1, 5.656854, %v176_v9 }
  0x86   :  { %138 = vmatprep.mubr.msk.f32.mxu0 %vm28_vm0, %v24_v10 }
  0x87   :  { %v21_v11 = vpop.permute.xlu0 %20 }
  0x88   :  { %vm23_vm2 = vcmp.eq.s32.totalorder %v15_v7, %v21_v11 }
  0x89   :  { %v25_v12 = vsel %vm23_vm2, 5.656854, %v176_v9 }
  0x8a   :  { %139 = vmatmul.mubr.msk.f32.vlgmr.msra.gmra.mrb[0].mxu0 %vm28_vm0, %v25_v12 }
 0x15d   :  { %v140_v13 = vpop.f32.mrb[0].mxu0 }
 0x15e   :  { %111 = vst [vmem:[#allocation2 + $0x8] sm:$0xff] %v140_v13  ;;  %v101_v14 = vpop.f32.mrb[1].mxu0 }
 0x15f   :  { %110 = vst [vmem:[#allocation2] sm:$0xff] %v101_v14 }
 0x160   :  { %162 = shalt.err (!%p159_p4)
}
 0x161   :  { %s163_s20 = scalar_lea.hbm %s221_s2, 256 }
 0x162   :  { %p164_p5 = scmp.ne.s32.totalorder %s221_s2, %s163_s20  ;;  %p167_p6 = scmp.lt.u32.totalorder %s163_s20, %s221_s2 }
 0x164   :  { %p169_p7 = pnand %p167_p6, %p164_p5 }
 0x166   :  { %172 = shalt.err (!%p169_p7)
}
 0x167   :  { %s178_s25 = smov 128   ;;  %s179_s26 = smov 8  }
 0x168   :  { %123 = dma.vmem_to_hbm [thread:$0]  %s118_s17, 256, %s221_s2, [#allocation3], %s178_s25, %s178_s25, %s179_s26  }
 0x169   :  { %173 = dma.done.wait [#allocation3], 256  }
 0x16a   :  { %174 = vsyncadd [#allocation3], 4294967040 }
 0x16b   :  { %127 = vsyncpa [#allocation3], 1 }

</bundles_post_ra>
